<compile_context>
chip_gen: v6e
topology: v6e:2x2x1
jax: 0.10.0
libtpu: 0.0.40
codegen_flags: <defaults>
</compile_context>

<pallas_src>
import jax
import jax.numpy as jnp
from jax.experimental import pallas as pl
from jax.experimental.pallas import tpu as pltpu

_LANE = 128
_PAD_LOGIT = -1.0e4  # padded logits contribute exactly 0 to all four sums


def _loss_kernel(x_ref, t_ref, w_ref, o_ref,
                 bce_acc, inter_acc, osum_acc, tsum_acc):
    """One grid step processes a (B, tile_r, 128) slab of the flattened inputs.

    Lane-wide scratch accumulators (VMEM, persistent across the inner sweep):
      bce_acc   (B, 128): partial sums of BCE element losses
      inter_acc (B, 128): partial sums of sigmoid(x) * target
      osum_acc  (B, 128): partial sums of sigmoid(x)
      tsum_acc  (B, 128): partial sums of target
    """
    s = pl.program_id(1)

    @pl.when(s == 0)
    def _():
        bce_acc[...] = jnp.zeros_like(bce_acc)
        inter_acc[...] = jnp.zeros_like(inter_acc)
        osum_acc[...] = jnp.zeros_like(osum_acc)
        tsum_acc[...] = jnp.zeros_like(tsum_acc)

    x = x_ref[...].astype(jnp.float32)          # (B, tile_r, 128)
    t = t_ref[...].astype(jnp.float32)
    w = w_ref[...].astype(jnp.float32)

    # Stable log-sigmoid: lp = log(sigmoid(x)) = -softplus(-x).
    lp = -(jnp.maximum(-x, 0.0) + jnp.log1p(jnp.exp(-jnp.abs(x))))
    p = jnp.exp(lp)                              # == sigmoid(x)
    tw = t - w                                   # target - weights

    # F.binary_cross_entropy clamps each log term at -100 (PyTorch semantics);
    # clamp is applied AFTER the log(1-p) = log(p) - x identity.
    log_p = jnp.maximum(lp, -100.0)
    log_1mp = jnp.maximum(lp - x, -100.0)        # log(1 - sigmoid(x))
    bce_elt = -(tw * log_p + (1.0 - tw) * log_1mp)

    # Collapse only the row axis; keep lanes wide (cross-lane reduce deferred).
    bce_acc[...] += jnp.sum(bce_elt, axis=1)
    inter_acc[...] += jnp.sum(p * t, axis=1)
    osum_acc[...] += jnp.sum(p, axis=1)
    tsum_acc[...] += jnp.sum(t, axis=1)

    @pl.when(s == pl.num_programs(1) - 1)
    def _():
        o_ref[0, 0] = bce_acc[...]
        o_ref[0, 1] = inter_acc[...]
        o_ref[0, 2] = osum_acc[...]
        o_ref[0, 3] = tsum_acc[...]


def weighted_unet_loss(output, target, weights, *,
                       target_block_bytes=2 * 1024 * 1024,
                       num_cores=2):
    """output, target, weights: NCHW arrays of identical shape."""
    b = output.shape[0]
    n_total = 1
    for d in output.shape[1:]:
        n_total *= d

    x = output.reshape(b, n_total).astype(jnp.float32)
    t = target.reshape(b, n_total).astype(jnp.float32)
    w = weights.reshape(b, n_total).astype(jnp.float32)

    # Row tiling: 128 lanes per row, tile_r rows (multiple of 8) per grid step,
    # sized so one f32 input block is ~target_block_bytes.
    r_raw = pl.cdiv(n_total, _LANE)
    tile_r = max(8, (target_block_bytes // (b * _LANE * 4)) // 8 * 8)
    tile_r = min(tile_r, pl.cdiv(r_raw, 8) * 8)
    steps = pl.cdiv(r_raw, num_cores * tile_r)
    r_pad = num_cores * steps * tile_r
    n_pad = r_pad * _LANE

    def pad3(a, val):
        a = jnp.pad(a, ((0, 0), (0, n_pad - n_total)), constant_values=val)
        return a.reshape(b, r_pad, _LANE)

    x3 = pad3(x, _PAD_LOGIT)
    t3 = pad3(t, 0.0)
    w3 = pad3(w, 0.0)

    in_spec = pl.BlockSpec((b, tile_r, _LANE),
                           lambda c, s: (0, c * steps + s, 0))
    out_spec = pl.BlockSpec((1, 4, b, _LANE), lambda c, s: (c, 0, 0, 0))

    parts = pl.pallas_call(
        _loss_kernel,
        out_shape=jax.ShapeDtypeStruct((num_cores, 4, b, _LANE), jnp.float32),
        grid_spec=pltpu.PrefetchScalarGridSpec(
            num_scalar_prefetch=0,
            grid=(num_cores, steps),
            in_specs=[in_spec, in_spec, in_spec],
            out_specs=out_spec,
            scratch_shapes=[
                pltpu.VMEM((b, _LANE), jnp.float32),  # bce partial sums
                pltpu.VMEM((b, _LANE), jnp.float32),  # intersection partials
                pltpu.VMEM((b, _LANE), jnp.float32),  # sigmoid(x) partials
                pltpu.VMEM((b, _LANE), jnp.float32),  # target partials
            ],
        ),
        compiler_params=pltpu.CompilerParams(
            dimension_semantics=("parallel", "arbitrary"),
            vmem_limit_bytes=48 * 1024 * 1024,
        ),
    )(x3, t3, w3)

    # Tiny JAX epilogue: fold per-core, lane-wide partial sums into the loss.
    sums = jnp.sum(parts, axis=(0, 3))                      # (4, B)
    bce_loss = jnp.sum(sums[0]) / jnp.float32(b * n_total)
    dice_per_image = 2.0 * sums[1] / (sums[2] + sums[3])
    dice_batch_loss = 1.0 - jnp.sum(dice_per_image) / jnp.float32(b)
    # TODO(synk): the torch module prints (dice_batch_loss, bce_loss) as a
    # host-side side effect; omitted here.
    return 0.5 * bce_loss + 2.0 * dice_batch_loss


def _reference_loss(output, target, weights):
    """Pure-JAX mirror of the torch forward (sigmoid + clamped BCE + DICE)."""
    b = output.shape[0]
    p = jax.nn.sigmoid(output.astype(jnp.float32)).reshape(b, -1)
    t = target.reshape(b, -1).astype(jnp.float32)
    tw = (target - weights).reshape(b, -1).astype(jnp.float32)
    log_p = jnp.maximum(jnp.log(p), -100.0)
    log_1mp = jnp.maximum(jnp.log(1.0 - p), -100.0)
    bce = jnp.mean(-(tw * log_p + (1.0 - tw) * log_1mp))
    inter = jnp.sum(p * t, axis=1)
    dice = 2.0 * inter / (jnp.sum(p, axis=1) + jnp.sum(t, axis=1))
    dice_loss = 1.0 - jnp.sum(dice) / b
    return 0.5 * bce + 2.0 * dice_loss


if __name__ == "__main__":
    key = jax.random.PRNGKey(0)
    k1, k2, k3 = jax.random.split(key, 3)

    B, C, H, W = 2, 4, 16, 16          # NCHW, matches torch conv convention
    output = jax.random.normal(k1, (B, C, H, W), dtype=jnp.float32)
    target = (jax.random.uniform(k2, (B, C, H, W)) > 0.5).astype(jnp.float32)
    weights = 0.1 * jax.random.uniform(k3, (B, C, H, W), dtype=jnp.float32)

    loss = jax.block_until_ready(weighted_unet_loss(output, target, weights))
    ref = _reference_loss(output, target, weights)
    assert jnp.allclose(loss, ref, rtol=1e-5, atol=1e-5), (loss, ref)

    # Ragged shape (N not a multiple of 128) exercises the padding path.
    k4, k5, k6 = jax.random.split(k1, 3)
    B2, C2, H2, W2 = 2, 3, 10, 10
    o2 = jax.random.normal(k4, (B2, C2, H2, W2), dtype=jnp.float32)
    t2 = (jax.random.uniform(k5, (B2, C2, H2, W2)) > 0.5).astype(jnp.float32)
    w2 = 0.05 * jax.random.uniform(k6, (B2, C2, H2, W2), dtype=jnp.float32)
    loss2 = jax.block_until_ready(weighted_unet_loss(o2, t2, w2))
    ref2 = _reference_loss(o2, t2, w2)
    assert jnp.allclose(loss2, ref2, rtol=1e-5, atol=1e-5), (loss2, ref2)

    print("KERNEL_OK")
</pallas_src>

<mosaic_0001>
module attributes {stable_mosaic.version = 11 : i64} {
  func.func @_loss_kernel(%arg0: i32, %arg1: i32, %arg2: memref<2x8x128xf32, #tpu.memory_space<vmem>>, %arg3: memref<2x8x128xf32, #tpu.memory_space<vmem>>, %arg4: memref<2x8x128xf32, #tpu.memory_space<vmem>>, %arg5: memref<1x4x2x128xf32, #tpu.memory_space<vmem>>, %arg6: memref<2x128xf32, #tpu.memory_space<vmem>>, %arg7: memref<2x128xf32, #tpu.memory_space<vmem>>, %arg8: memref<2x128xf32, #tpu.memory_space<vmem>>, %arg9: memref<2x128xf32, #tpu.memory_space<vmem>>) attributes {dimension_semantics = [#tpu.dimension_semantics<parallel>, #tpu.dimension_semantics<arbitrary>], iteration_bounds = array<i64: 2, 1>, scalar_prefetch = 0 : i64, scratch_operands = 4 : i64, tpu.core_type = #tpu.core_type<tc>, window_params = [{transform_indices = @transform_0, window_bounds = array<i64: 2, 8, 128>}, {transform_indices = @transform_1, window_bounds = array<i64: 2, 8, 128>}, {transform_indices = @transform_2, window_bounds = array<i64: 2, 8, 128>}, {transform_indices = @transform_3, window_bounds = array<i64: 1, 4, 2, 128>}]} {
    %c0_i32 = arith.constant 0 : i32
    %0 = arith.cmpi eq, %arg1, %c0_i32 : i32
    %1 = arith.extui %0 : i1 to i32
    %c0_i32_0 = arith.constant 0 : i32
    %2 = arith.cmpi ne, %1, %c0_i32_0 : i32
    scf.if %2 {
      %cst_38 = arith.constant 0.000000e+00 : f32
      %52 = vector.broadcast %cst_38 : f32 to vector<2x128xf32>
      %c0_39 = arith.constant 0 : index
      %c0_40 = arith.constant 0 : index
      %53 = vector.load %arg6[%c0_39, %c0_40] : memref<2x128xf32, #tpu.memory_space<vmem>>, vector<2x128xf32>
      tpu.vector_store %arg6[%c0_39, %c0_40], %52 {strides = array<i32>} : memref<2x128xf32, #tpu.memory_space<vmem>>, vector<2x128xf32>,
      %cst_41 = arith.constant 0.000000e+00 : f32
      %54 = vector.broadcast %cst_41 : f32 to vector<2x128xf32>
      %c0_42 = arith.constant 0 : index
      %c0_43 = arith.constant 0 : index
      %55 = vector.load %arg7[%c0_42, %c0_43] : memref<2x128xf32, #tpu.memory_space<vmem>>, vector<2x128xf32>
      tpu.vector_store %arg7[%c0_42, %c0_43], %54 {strides = array<i32>} : memref<2x128xf32, #tpu.memory_space<vmem>>, vector<2x128xf32>,
      %cst_44 = arith.constant 0.000000e+00 : f32
      %56 = vector.broadcast %cst_44 : f32 to vector<2x128xf32>
      %c0_45 = arith.constant 0 : index
      %c0_46 = arith.constant 0 : index
      %57 = vector.load %arg8[%c0_45, %c0_46] : memref<2x128xf32, #tpu.memory_space<vmem>>, vector<2x128xf32>
      tpu.vector_store %arg8[%c0_45, %c0_46], %56 {strides = array<i32>} : memref<2x128xf32, #tpu.memory_space<vmem>>, vector<2x128xf32>,
      %cst_47 = arith.constant 0.000000e+00 : f32
      %58 = vector.broadcast %cst_47 : f32 to vector<2x128xf32>
      %c0_48 = arith.constant 0 : index
      %c0_49 = arith.constant 0 : index
      %59 = vector.load %arg9[%c0_48, %c0_49] : memref<2x128xf32, #tpu.memory_space<vmem>>, vector<2x128xf32>
      tpu.vector_store %arg9[%c0_48, %c0_49], %58 {strides = array<i32>} : memref<2x128xf32, #tpu.memory_space<vmem>>, vector<2x128xf32>,
    } else {
    }
    %c0 = arith.constant 0 : index
    %c0_1 = arith.constant 0 : index
    %c0_2 = arith.constant 0 : index
    %3 = vector.load %arg2[%c0, %c0_1, %c0_2] : memref<2x8x128xf32, #tpu.memory_space<vmem>>, vector<2x8x128xf32>
    %c0_3 = arith.constant 0 : index
    %c0_4 = arith.constant 0 : index
    %c0_5 = arith.constant 0 : index
    %4 = vector.load %arg3[%c0_3, %c0_4, %c0_5] : memref<2x8x128xf32, #tpu.memory_space<vmem>>, vector<2x8x128xf32>
    %c0_6 = arith.constant 0 : index
    %c0_7 = arith.constant 0 : index
    %c0_8 = arith.constant 0 : index
    %5 = vector.load %arg4[%c0_6, %c0_7, %c0_8] : memref<2x8x128xf32, #tpu.memory_space<vmem>>, vector<2x8x128xf32>
    %cst = arith.constant 0.000000e+00 : f32
    %6 = vector.broadcast %cst : f32 to vector<2x8x128xf32>
    %7 = arith.subf %6, %3 : vector<2x8x128xf32>
    %cst_9 = arith.constant 0.000000e+00 : f32
    %8 = vector.broadcast %cst_9 : f32 to vector<2x8x128xf32>
    %9 = arith.maximumf %7, %8 : vector<2x8x128xf32>
    %10 = math.absf %3 : vector<2x8x128xf32>
    %cst_10 = arith.constant 0.000000e+00 : f32
    %11 = vector.broadcast %cst_10 : f32 to vector<2x8x128xf32>
    %12 = arith.subf %11, %10 : vector<2x8x128xf32>
    %13 = math.exp %12 : vector<2x8x128xf32>
    %14 = math.log1p %13 : vector<2x8x128xf32>
    %15 = arith.addf %9, %14 : vector<2x8x128xf32>
    %cst_11 = arith.constant 0.000000e+00 : f32
    %16 = vector.broadcast %cst_11 : f32 to vector<2x8x128xf32>
    %17 = arith.subf %16, %15 : vector<2x8x128xf32>
    %18 = math.exp %17 : vector<2x8x128xf32>
    %19 = arith.subf %4, %5 : vector<2x8x128xf32>
    %cst_12 = arith.constant -1.000000e+02 : f32
    %20 = vector.broadcast %cst_12 : f32 to vector<2x8x128xf32>
    %21 = arith.maximumf %17, %20 : vector<2x8x128xf32>
    %22 = arith.subf %17, %3 : vector<2x8x128xf32>
    %cst_13 = arith.constant -1.000000e+02 : f32
    %23 = vector.broadcast %cst_13 : f32 to vector<2x8x128xf32>
    %24 = arith.maximumf %22, %23 : vector<2x8x128xf32>
    %25 = arith.mulf %19, %21 : vector<2x8x128xf32>
    %cst_14 = arith.constant 1.000000e+00 : f32
    %26 = vector.broadcast %cst_14 : f32 to vector<2x8x128xf32>
    %27 = arith.subf %26, %19 : vector<2x8x128xf32>
    %28 = arith.mulf %27, %24 : vector<2x8x128xf32>
    %29 = arith.addf %25, %28 : vector<2x8x128xf32>
    %cst_15 = arith.constant 0.000000e+00 : f32
    %30 = vector.broadcast %cst_15 : f32 to vector<2x8x128xf32>
    %31 = arith.subf %30, %29 : vector<2x8x128xf32>
    %c0_16 = arith.constant 0 : index
    %c0_17 = arith.constant 0 : index
    %32 = vector.load %arg6[%c0_16, %c0_17] : memref<2x128xf32, #tpu.memory_space<vmem>>, vector<2x128xf32>
    %cst_18 = arith.constant dense<0.000000e+00> : vector<2x128xf32>
    %33 = vector.multi_reduction <add>, %31, %cst_18 [1] : vector<2x8x128xf32> to vector<2x128xf32>
    %34 = arith.addf %32, %33 : vector<2x128xf32>
    %c0_19 = arith.constant 0 : index
    %c0_20 = arith.constant 0 : index
    %35 = vector.load %arg6[%c0_19, %c0_20] : memref<2x128xf32, #tpu.memory_space<vmem>>, vector<2x128xf32>
    tpu.vector_store %arg6[%c0_19, %c0_20], %34 {strides = array<i32>} : memref<2x128xf32, #tpu.memory_space<vmem>>, vector<2x128xf32>,
    %c0_21 = arith.constant 0 : index
    %c0_22 = arith.constant 0 : index
    %36 = vector.load %arg7[%c0_21, %c0_22] : memref<2x128xf32, #tpu.memory_space<vmem>>, vector<2x128xf32>
    %37 = arith.mulf %18, %4 : vector<2x8x128xf32>
    %cst_23 = arith.constant dense<0.000000e+00> : vector<2x128xf32>
    %38 = vector.multi_reduction <add>, %37, %cst_23 [1] : vector<2x8x128xf32> to vector<2x128xf32>
    %39 = arith.addf %36, %38 : vector<2x128xf32>
    %c0_24 = arith.constant 0 : index
    %c0_25 = arith.constant 0 : index
    %40 = vector.load %arg7[%c0_24, %c0_25] : memref<2x128xf32, #tpu.memory_space<vmem>>, vector<2x128xf32>
    tpu.vector_store %arg7[%c0_24, %c0_25], %39 {strides = array<i32>} : memref<2x128xf32, #tpu.memory_space<vmem>>, vector<2x128xf32>,
    %c0_26 = arith.constant 0 : index
    %c0_27 = arith.constant 0 : index
    %41 = vector.load %arg8[%c0_26, %c0_27] : memref<2x128xf32, #tpu.memory_space<vmem>>, vector<2x128xf32>
    %cst_28 = arith.constant dense<0.000000e+00> : vector<2x128xf32>
    %42 = vector.multi_reduction <add>, %18, %cst_28 [1] : vector<2x8x128xf32> to vector<2x128xf32>
    %43 = arith.addf %41, %42 : vector<2x128xf32>
    %c0_29 = arith.constant 0 : index
    %c0_30 = arith.constant 0 : index
    %44 = vector.load %arg8[%c0_29, %c0_30] : memref<2x128xf32, #tpu.memory_space<vmem>>, vector<2x128xf32>
    tpu.vector_store %arg8[%c0_29, %c0_30], %43 {strides = array<i32>} : memref<2x128xf32, #tpu.memory_space<vmem>>, vector<2x128xf32>,
    %c0_31 = arith.constant 0 : index
    %c0_32 = arith.constant 0 : index
    %45 = vector.load %arg9[%c0_31, %c0_32] : memref<2x128xf32, #tpu.memory_space<vmem>>, vector<2x128xf32>
    %cst_33 = arith.constant dense<0.000000e+00> : vector<2x128xf32>
    %46 = vector.multi_reduction <add>, %4, %cst_33 [1] : vector<2x8x128xf32> to vector<2x128xf32>
    %47 = arith.addf %45, %46 : vector<2x128xf32>
    %c0_34 = arith.constant 0 : index
    %c0_35 = arith.constant 0 : index
    %48 = vector.load %arg9[%c0_34, %c0_35] : memref<2x128xf32, #tpu.memory_space<vmem>>, vector<2x128xf32>
    tpu.vector_store %arg9[%c0_34, %c0_35], %47 {strides = array<i32>} : memref<2x128xf32, #tpu.memory_space<vmem>>, vector<2x128xf32>,
    %c0_i32_36 = arith.constant 0 : i32
    %49 = arith.cmpi eq, %arg1, %c0_i32_36 : i32
    %50 = arith.extui %49 : i1 to i32
    %c0_i32_37 = arith.constant 0 : i32
    %51 = arith.cmpi ne, %50, %c0_i32_37 : i32
    scf.if %51 {
      %c0_38 = arith.constant 0 : index
      %c0_39 = arith.constant 0 : index
      %52 = vector.load %arg6[%c0_38, %c0_39] : memref<2x128xf32, #tpu.memory_space<vmem>>, vector<2x128xf32>
      %c0_40 = arith.constant 0 : index
      %c0_41 = arith.constant 0 : index
      %c0_42 = arith.constant 0 : index
      %c0_43 = arith.constant 0 : index
      %53 = vector.load %arg5[%c0_40, %c0_41, %c0_42, %c0_43] : memref<1x4x2x128xf32, #tpu.memory_space<vmem>>, vector<1x1x2x128xf32>
      %54 = vector.shape_cast %53 : vector<1x1x2x128xf32> to vector<2x128xf32>
      %55 = vector.shape_cast %52 : vector<2x128xf32> to vector<1x1x2x128xf32>
      tpu.vector_store %arg5[%c0_40, %c0_41, %c0_42, %c0_43], %55 {strides = array<i32>} : memref<1x4x2x128xf32, #tpu.memory_space<vmem>>, vector<1x1x2x128xf32>,
      %c0_44 = arith.constant 0 : index
      %c0_45 = arith.constant 0 : index
      %56 = vector.load %arg7[%c0_44, %c0_45] : memref<2x128xf32, #tpu.memory_space<vmem>>, vector<2x128xf32>
      %c0_46 = arith.constant 0 : index
      %c1 = arith.constant 1 : index
      %c0_47 = arith.constant 0 : index
      %c0_48 = arith.constant 0 : index
      %57 = vector.load %arg5[%c0_46, %c1, %c0_47, %c0_48] : memref<1x4x2x128xf32, #tpu.memory_space<vmem>>, vector<1x1x2x128xf32>
      %58 = vector.shape_cast %57 : vector<1x1x2x128xf32> to vector<2x128xf32>
      %59 = vector.shape_cast %56 : vector<2x128xf32> to vector<1x1x2x128xf32>
      tpu.vector_store %arg5[%c0_46, %c1, %c0_47, %c0_48], %59 {strides = array<i32>} : memref<1x4x2x128xf32, #tpu.memory_space<vmem>>, vector<1x1x2x128xf32>,
      %c0_49 = arith.constant 0 : index
      %c0_50 = arith.constant 0 : index
      %60 = vector.load %arg8[%c0_49, %c0_50] : memref<2x128xf32, #tpu.memory_space<vmem>>, vector<2x128xf32>
      %c0_51 = arith.constant 0 : index
      %c2 = arith.constant 2 : index
      %c0_52 = arith.constant 0 : index
      %c0_53 = arith.constant 0 : index
      %61 = vector.load %arg5[%c0_51, %c2, %c0_52, %c0_53] : memref<1x4x2x128xf32, #tpu.memory_space<vmem>>, vector<1x1x2x128xf32>
      %62 = vector.shape_cast %61 : vector<1x1x2x128xf32> to vector<2x128xf32>
      %63 = vector.shape_cast %60 : vector<2x128xf32> to vector<1x1x2x128xf32>
      tpu.vector_store %arg5[%c0_51, %c2, %c0_52, %c0_53], %63 {strides = array<i32>} : memref<1x4x2x128xf32, #tpu.memory_space<vmem>>, vector<1x1x2x128xf32>,
      %c0_54 = arith.constant 0 : index
      %c0_55 = arith.constant 0 : index
      %64 = vector.load %arg9[%c0_54, %c0_55] : memref<2x128xf32, #tpu.memory_space<vmem>>, vector<2x128xf32>
      %c0_56 = arith.constant 0 : index
      %c3 = arith.constant 3 : index
      %c0_57 = arith.constant 0 : index
      %c0_58 = arith.constant 0 : index
      %65 = vector.load %arg5[%c0_56, %c3, %c0_57, %c0_58] : memref<1x4x2x128xf32, #tpu.memory_space<vmem>>, vector<1x1x2x128xf32>
      %66 = vector.shape_cast %65 : vector<1x1x2x128xf32> to vector<2x128xf32>
      %67 = vector.shape_cast %64 : vector<2x128xf32> to vector<1x1x2x128xf32>
      tpu.vector_store %arg5[%c0_56, %c3, %c0_57, %c0_58], %67 {strides = array<i32>} : memref<1x4x2x128xf32, #tpu.memory_space<vmem>>, vector<1x1x2x128xf32>,
    } else {
    }
    return
  }
  func.func @transform_0(%arg0: i32, %arg1: i32) -> (i32, i32, i32) {
    %c1_i32 = arith.constant 1 : i32
    %0 = arith.muli %arg0, %c1_i32 : i32
    %1 = arith.addi %0, %arg1 : i32
    %c0_i32 = arith.constant 0 : i32
    %c0_i32_0 = arith.constant 0 : i32
    %c0_i32_1 = arith.constant 0 : i32
    return %c0_i32, %1, %c0_i32_0 : i32, i32, i32
  }
  func.func @transform_1(%arg0: i32, %arg1: i32) -> (i32, i32, i32) {
    %c1_i32 = arith.constant 1 : i32
    %0 = arith.muli %arg0, %c1_i32 : i32
    %1 = arith.addi %0, %arg1 : i32
    %c0_i32 = arith.constant 0 : i32
    %c0_i32_0 = arith.constant 0 : i32
    %c0_i32_1 = arith.constant 0 : i32
    return %c0_i32, %1, %c0_i32_0 : i32, i32, i32
  }
  func.func @transform_2(%arg0: i32, %arg1: i32) -> (i32, i32, i32) {
    %c1_i32 = arith.constant 1 : i32
    %0 = arith.muli %arg0, %c1_i32 : i32
    %1 = arith.addi %0, %arg1 : i32
    %c0_i32 = arith.constant 0 : i32
    %c0_i32_0 = arith.constant 0 : i32
    %c0_i32_1 = arith.constant 0 : i32
    return %c0_i32, %1, %c0_i32_0 : i32, i32, i32
  }
  func.func @transform_3(%arg0: i32, %arg1: i32) -> (i32, i32, i32, i32) {
    %c0_i32 = arith.constant 0 : i32
    %c0_i32_0 = arith.constant 0 : i32
    %c0_i32_1 = arith.constant 0 : i32
    %c0_i32_2 = arith.constant 0 : i32
    return %arg0, %c0_i32, %c0_i32_0, %c0_i32_1 : i32, i32, i32, i32
  }
}

</mosaic_0001>

<bundles_post_ra>
// kernel: tpu_custom_call.1
= control target key start
LH: loop header
LB: loop body
LE: loop exit
PB: predicated region body
PF: predicated region fallthrough
CT: control target
= control target key end

     0   :  { %s1152_s0 = inlined_call_operand.hbm [shape: f32[2,16,128], index: 0, kind: input, shape index: {}]   ;;  %s1153_s1 = inlined_call_operand.hbm [shape: f32[2,16,128], index: 1, kind: input, shape index: {}]   ;;  %s1154_s2 = inlined_call_operand.hbm [shape: f32[2,16,128], index: 2, kind: input, shape index: {}]   ;;  %s1155_s3 = inlined_call_operand.hbm [shape: f32[2,4,2,128], index: 3, kind: output, shape index: {}]  }
   0x1   :  { %1161 = sst [smem:[#allocation19_spill]] %s1152_s0 }
   0x2   :  { %1162 = sst [smem:[#allocation20_spill]] %s1153_s1 }
   0x3   :  { %8 = vsyncpa [#allocation7], 0 }
   0x4   :  { %10 = vsyncpa [#allocation7 + $0x1], 0 }
   0x5   :  { %11 = vsyncpa [#allocation10], 0 }
   0x6   :  { %13 = vsyncpa [#allocation10 + $0x1], 0 }
   0x7   :  { %14 = vsyncpa [#allocation8], 0 }
   0x8   :  { %16 = vsyncpa [#allocation8 + $0x1], 0  ;;  %s905_s12 = smov 0   ;;  %s907_s13 = smov 0  }
   0x9   :  { %s909_s14 = smov 0   ;;  %s911_s15 = smov 0  }
   0xa   :  { %s913_s16 = smov 0   ;;  %s915_s17 = smov 0  }
   0xb LB: > { %1163 = sst [smem:[#allocation16_spill]] %s869_s16  ;;  %s936_s18 = sadd.s32 4294967295, %s873_s17   ;;  %s873_s17 = sphi %s915_s17, %s22_s17   ;;  %s869_s16 = sphi %s913_s16, %s1178_s16   ;;  %s865_s15 = sphi %s911_s15, %s1177_s15   ;;  %s861_s14 = sphi %s909_s14, %s1181_s14   ;;  %s857_s13 = sphi %s907_s13, %s1180_s13   ;;  %s853_s12 = sphi %s905_s12, %s1179_s12  }
   0xc   : > { %s592_s19 = sadd.s32 4294967294, %s873_s17   ;;  %s34_s20 = sadd.s32 1, %s869_s16 }
   0xd   : > { %s43_s21 = sadd.s32 1, %s861_s14  ;;  %p36_p0 = scmp.ge.s32.totalorder %s34_s20, 2 }
   0xe   : > { %p50_p1 = scmp.ne.s32.totalorder %s861_s14, %s857_s13  ;;  %p51_p2 = scmp.eq.s32.totalorder %s873_s17, 0 }
   0xf   : > { %p56_p3 = scmp.ne.s32.totalorder %s857_s13, %s853_s12  ;;  %s1183_s20 = smov (%p36_p0, %s34_s20), 0 }
  0x10   : > { %1164 = sst [smem:[#allocation17_spill]] %s1183_s20  ;;  %p948_p4 = por %p51_p2, %p50_p1 }
  0x11   : > { %p57_p5 = scmp.eq.s32.totalorder %s936_s18, 0  ;;  %s40_s23 = ssub.s32 %s869_s16, %s1183_s20 }
  0x12   : > { %p136_p6 = scmp.eq.s32.totalorder %s936_s18, 1  ;;  %p41_p7 = scmp.eq.s32.totalorder %s40_s23, 0 }
  0x13   : > { %p956_p8 = por %p57_p5, %p56_p3  ;;  %p142_p10 = scmp.eq.s32.totalorder %s592_s19, 1 }
  0x14   : > { %p960_p9 = por %p136_p6, %p50_p1  ;;  %p594_p12 = scmp.ge.s32.totalorder %s873_s17, 2 }
  0x15   : > { %s965_s26 = scalar_select %p41_p7, %s861_s14, %s43_s21  }
  0x16   : > { %p967_p11 = por %p142_p10, %p56_p3  ;;  %p637_p13 = scmp.lt.s32.totalorder %s873_s17, 2 }
  0x17   : > { %1168 = sst [smem:[#allocation18_spill]] %s965_s26  ;;  %s1156_s28 = sand.u32 1, %s861_s14  }
  0x18   : > { %s976_s29 = sshll.u32 %s1156_s28, 4  ;;  %s979_s30 = sshll.u32 %s869_s16, 7 }
  0x19   : > { %p983_p0 = pnand %p637_p13, %p948_p4  ;;  %s183_s5 = sand.u32 1, %s873_s17  }
  0x1a   : > { %s1171_s1 = sld [smem:[#allocation20_spill]]  ;;  %s187_s9 = scalar_lea.vmem [#allocation9], %s976_s29 }
  0x1b   : > { %s194_s10 = sshll.u32 %s187_s9, 4  ;;  %p601_p1 = scmp.ge.s32.totalorder %s873_s17, 1  ;;  %s195_s10 = int_to_ptr.vmem [resolvable:$true] %s194_s10 }
  0x1c   : > { %s994_s11 = scalar_lea.sflag [#allocation10], %s183_s5  ;;  %p707_p2 = pneg %p983_p0 }
  0x1d   : > { %s718_s19 = scalar_lea.vmem %s195_s10, 256  ;;  %s875_s21 = smov [#allocation9]  }
  0x1e   : > { %p719_p3 = scmp.ne.s32.totalorder %s195_s10, %s718_s19  ;;  %s723_s22 = sshll.u32 %s875_s21, 4  ;;  %s724_s22 = int_to_ptr.vmem [resolvable:$false] %s723_s22 }
  0x1f   : > { %s725_s23 = scalar_lea.vmem %s724_s22, 512  ;;  %p726_p6 = scmp.lt.s32.totalorder %s195_s10, %s724_s22 }
  0x20   : > { %s193_s8 = scalar_lea.hbm %s1171_s1, %s979_s30  ;;  %p721_p4 = pnand %p719_p3, %p707_p2 }
  0x21   : > { %p727_p7 = scmp.lt.s32.totalorder %s725_s23, %s718_s19 }
  0x22   : > { %p722_p5 = pneg %p721_p4 }
  0x23   : > { %p728_p10 = por %p727_p7, %p726_p6 }
  0x25   : > { %p729_p13 = pnand %p728_p10, %p722_p5 }
  0x27   : > { %732 = shalt.err (!%p729_p13)
}
  0x28   : > { %s1159_s6 = smov 256   ;;  %s877_s5 = smov 128  }
  0x29   : > { %s878_s7 = smov 8   ;;  %p223_p3 = scmp.lt.s32.totalorder %s873_s17, 3 }
  0x2a   : > { %629 = dma.hbm_to_vmem [thread:$0]  (!%p983_p0), %s193_s8, 256, %s195_s10, %s994_s11, %s1159_s6, %s877_s5, %s878_s7  }
  0x2b   : > { %p1010_p4 = pnand %p601_p1, %p223_p3  ;;  %s1173_s0 = sld [smem:[#allocation19_spill]] }
  0x2c   : > { %s166_s23 = scalar_lea.vmem [#allocation6], %s976_s29  ;;  %s1174_s1 = sand.u32 1, %s861_s14  }
  0x2d   : > { %s173_s28 = sshll.u32 %s166_s23, 4  ;;  %s163_s20 = scalar_lea.sflag [#allocation7], %s1174_s1  ;;  %s174_s28 = int_to_ptr.vmem [resolvable:$true] %s173_s28 }
  0x2e   : > { %s746_s16 = scalar_lea.vmem %s174_s28, 256  ;;  %s879_s8 = smov [#allocation6]  }
  0x2f   : > { %p747_p5 = scmp.ne.s32.totalorder %s174_s28, %s746_s16  ;;  %s751_s10 = sshll.u32 %s879_s8, 4  ;;  %s752_s10 = int_to_ptr.vmem [resolvable:$false] %s751_s10 }
  0x30   : > { %s753_s6 = scalar_lea.vmem %s752_s10, 512  ;;  %p754_p1 = scmp.lt.s32.totalorder %s174_s28, %s752_s10 }
  0x31   : > { %s172_s22 = scalar_lea.hbm %s1173_s0, %s979_s30  ;;  %p749_p6 = pnand %p747_p5, %p707_p2 }
  0x32   : > { %p755_p10 = scmp.lt.s32.totalorder %s753_s6, %s746_s16 }
  0x33   : > { %p750_p7 = pneg %p749_p6 }
  0x34   : > { %p756_p13 = por %p755_p10, %p754_p1 }
  0x36   : > { %p757_p3 = pnand %p756_p13, %p750_p7 }
  0x38   : > { %760 = shalt.err (!%p757_p3)
}
  0x39   : > { %s1175_s1 = smov 256   ;;  %s214_s23 = scalar_lea.hbm %s1154_s2, %s979_s30 }
  0x3a   : > { %626 = dma.hbm_to_vmem [thread:$0]  (!%p983_p0), %s172_s22, 256, %s174_s28, %s163_s20, %s1175_s1, %s877_s5, %s878_s7  }
  0x3b   : > { %s208_s8 = scalar_lea.vmem [#allocation11], %s976_s29  ;;  %s880_s6 = smov [#allocation11]  }
  0x3c   : > { %s215_s0 = sshll.u32 %s208_s8, 4  ;;  %s779_s10 = sshll.u32 %s880_s6, 4  ;;  %s216_s0 = int_to_ptr.vmem [resolvable:$true] %s215_s0  ;;  %s780_s10 = int_to_ptr.vmem [resolvable:$false] %s779_s10 }
  0x3d   : > { %s774_s16 = scalar_lea.vmem %s216_s0, 256  ;;  %s781_s26 = scalar_lea.vmem %s780_s10, 512 }
  0x3e   : > { %p775_p5 = scmp.ne.s32.totalorder %s216_s0, %s774_s16  ;;  %p782_p1 = scmp.lt.s32.totalorder %s216_s0, %s780_s10 }
  0x3f   : > { %p783_p10 = scmp.lt.s32.totalorder %s781_s26, %s774_s16 }
  0x40   : > { %p777_p6 = pnand %p775_p5, %p707_p2 }
  0x41   : > { %p784_p13 = por %p783_p10, %p782_p1 }
  0x42   : > { %p778_p7 = pneg %p777_p6 }
  0x44   : > { %p785_p3 = pnand %p784_p13, %p778_p7 }
  0x46   : > { %788 = shalt.err (!%p785_p3)
}
  0x47   : > { %632 = dma.hbm_to_vmem [thread:$0]  (!%p983_p0), %s214_s23, 256, %s216_s0, %s994_s11, %s1175_s1, %s877_s5, %s878_s7  }
  0x48   : > { %227 = sbr.rel (%p1010_p4) target bundleno = 183 (0xb7), region = 32  ;;  %s1046_s20 = sand.u32 (!%p1010_p4), 1, %s857_s13  }
  0x49   : > { %s1049_s26 = sshll.u32 (!%p1010_p4), %s1046_s20, 4  ;;  %s230_s28 = scalar_lea.sflag (!%p1010_p4), [#allocation7], %s1046_s20 }
  0x4a   : > { %s233_s29 = scalar_lea.vmem (!%p1010_p4), [#allocation6], %s1049_s26 }
  0x4d   : > { %840 = dma.done.wait (%p956_p8), %s230_s28, 256  }
  0x4e   : > { %842 = vsyncadd (%p956_p8), %s230_s28, 4294967040  ;;  %s238_s0 = sand.u32 1, %s936_s18   ;;  %s242_s4 = scalar_lea.vmem [#allocation9], %s1049_s26 }
  0x4f   : > { %s239_s30 = scalar_lea.sflag [#allocation10], %s238_s0 }
  0x50   : > { %844 = dma.done.wait (%p956_p8), %s239_s30, 512  }
  0x51   : > { %846 = vsyncadd (%p956_p8), %s239_s30, 4294966784  ;;  %v881_v0 = vmov 0.0   ;;  %v1063_v1 = vld [vmem:[%s233_s29] sm:$0xff]  ;;  %v1065_v2 = vld [vmem:[%s233_s29 + $0x8] sm:$0xff]  ;;  %vm372_vm0 = vcmask 1041409   ;;  %s605_s18 = sshll.u32 %s1046_s20, 3 }
  0x52   : > { %291 = vst [vmem:[#allocation2] sm:$0x3] %v881_v0  ;;  %292 = vst [vmem:[#allocation3] sm:$0x3] %v881_v0  ;;  %v1067_v3 = vld [vmem:[%s242_s4] sm:$0xff]  ;;  %v1073_v8 = vld [vmem:[%s242_s4 + $0x8] sm:$0xff] }
  0x53   : > { %293 = vst [vmem:[#allocation4] sm:$0x3] %v881_v0  ;;  %294 = vst [vmem:[#allocation5] sm:$0x3] %v881_v0  ;;  %v418_v4 = vrot.slane %v1067_v3, 4  ;;  %v424_v12 = vrot.slane %v1073_v8, 4 }
  0x54   : > { %v305_v5 = vand.u32 2147483647, %v1063_v1  ;;  %v306_v6 = vand.u32 2147483647, %v1065_v2  ;;  %s1079_s24 = scalar_lea.vmem [#allocation12], %s605_s18  ;;  %v301_v34 = vsub.f32 0.0, %v1063_v1 }
  0x55   : > { %v419_v7 = vadd.f32 %v418_v4, %v1067_v3  ;;  %v425_v16 = vadd.f32 %v424_v12, %v1073_v8  ;;  %v302_v37 = vsub.f32 0.0, %v1065_v2  ;;  %s251_s11 = scalar_lea.vmem [#allocation11], %s1049_s26  ;;  %s464_s5 = sshll.u32 %s1079_s24, 4  ;;  %s1097_s5 = int_to_ptr.vmem [resolvable:$true] %s464_s5 }
  0x56   : > { %v307_v9 = vsub.f32 0.0, %v305_v5  ;;  %v308_v10 = vsub.f32 0.0, %v306_v6  ;;  %v303_v41 = vmax.f32 %v301_v34, 0.0  ;;  %v299_v44 = vld [vmem:[%s251_s11] sm:$0xff]  ;;  %v300_v47 = vld [vmem:[%s251_s11 + $0x8] sm:$0xff]  ;;  %s614_s7 = sshll.u32 %s865_s15, 7 }
  0x57   : > { %v420_v11 = vrot.slane %v419_v7, 2  ;;  %v426_v18 = vrot.slane %v425_v16, 2  ;;  %v304_v45 = vmax.f32 %v302_v37, 0.0  ;;  %v339_v52 = vsub.f32 %v1067_v3, %v299_v44  ;;  %s1102_s1 = scalar_lea.hbm %s1155_s3, %s614_s7  ;;  %s451_s19 = scalar_lea.sflag [#allocation8], %s1046_s20 }
  0x58   : > { %v309_v13 = vmul.f32 1.442695, %v307_v9  ;;  %v311_v14 = vmul.f32 1.442695, %v308_v10  ;;  %v340_v54 = vsub.f32 %v1073_v8, %v300_v47  ;;  %s789_s21 = scalar_lea.vmem %s1097_s5, 128  ;;  %s882_s15 = smov [#allocation12]  }
  0x59   : > { %v421_v15 = vadd.f32 %v420_v11, %v419_v7  ;;  %v427_v19 = vadd.f32 %v426_v18, %v425_v16  ;;  %v349_v60 = vsub.f32 1.0, %v339_v52  ;;  %p790_p8 = scmp.ne.s32.totalorder %s1097_s5, %s789_s21  ;;  %s793_s23 = sshll.u32 %s882_s15, 4  ;;  %s794_s23 = int_to_ptr.vmem [resolvable:$false] %s793_s23 }
  0x5a   : > { %693 = vpow2.f32 %v309_v13  ;;  %v417_v22 = vld [vmem:[#allocation5] sm:$0x3]  ;;  %v350_v0 = vsub.f32 1.0, %v340_v54  ;;  %s795_s8 = scalar_lea.vmem %s794_s23, 256  ;;  %p796_p4 = scmp.lt.s32.totalorder %s1097_s5, %s794_s23 }
  0x5b   : > { %695 = vpow2.f32 %v311_v14  ;;  %v422_v17 = vrot.slane %v421_v15, 1  ;;  %v428_v21 = vrot.slane %v427_v19, 1  ;;  %p791_p0 = pnand %p790_p8, %p960_p9  ;;  %p797_p5 = scmp.lt.s32.totalorder %s795_s8, %s789_s21 }
  0x5d   : > { %v423_v20 = vadd.f32 %v422_v17, %v421_v15  ;;  %v429_v23 = vadd.f32 %v428_v21, %v427_v19  ;;  %p792_p2 = pneg %p791_p0  ;;  %p798_p6 = por %p797_p5, %p796_p4 }
  0x5f   : > { %v432_v24 = vsel %vm372_vm0, %v429_v23, %v423_v20  ;;  %p799_p7 = pnand %p798_p6, %p792_p2 }
  0x60   : > { %v434_v25 = vadd.f32 %v432_v24, %v417_v22 }
  0x62   : > { %435 = vst [vmem:[#allocation5] sm:$0x3] %v434_v25 }
  0x67   : > { %v694_v26 = vpop.eup %693 }
  0x68   : > { %v696_v27 = vpop.eup %695  ;;  %v313_v28 = vadd.f32 1.0, %v694_v26  ;;  %v316_v31 = vmul.f32 -0.5, %v694_v26  ;;  %v319_v35 = vand.u32 2147483647, %v694_v26 }
  0x69   : > { %v322_v29 = vadd.f32 1.0, %v696_v27  ;;  %v447_v30 = vld [vmem:[#allocation5] sm:$0x3]  ;;  %v325_v32 = vmul.f32 -0.5, %v696_v27  ;;  %v328_v38 = vand.u32 2147483647, %v696_v27 }
  0x6a   : > { %697 = vlog2.f32 %v313_v28  ;;  %608 = vst [vmem:[%s1079_s24 + $0x6] sm:$0x3] %v447_v30  ;;  %v317_v33 = vadd.f32 1.0, %v316_v31  ;;  %vm320_vm1 = vcmp.lt.f32.partialorder %v319_v35, 0.0004427343 }
  0x6b   : > { %699 = vlog2.f32 %v322_v29  ;;  %v326_v36 = vadd.f32 1.0, %v325_v32  ;;  %vm329_vm2 = vcmp.lt.f32.partialorder %v328_v38, 0.0004427343 }
  0x6c   : > { %v318_v39 = vmul.f32 %v694_v26, %v317_v33 }
  0x6d   : > { %v327_v42 = vmul.f32 %v696_v27, %v326_v36  ;;  %v357_v36 = vld [vmem:[#allocation2] sm:$0x3] }
  0x77   : > { %v698_v40 = vpop.eup %697 }
  0x78   : > { %v700_v43 = vpop.eup %699  ;;  %v315_v46 = vmul.f32 0.6931472, %v698_v40 }
  0x79   : > { %v324_v48 = vmul.f32 0.6931472, %v700_v43 }
  0x7a   : > { %v321_v49 = vsel %vm320_vm1, %v318_v39, %v315_v46 }
  0x7b   : > { %v330_v50 = vsel %vm329_vm2, %v327_v42, %v324_v48  ;;  %v331_v51 = vadd.f32 %v321_v49, %v303_v41 }
  0x7c   : > { %v332_v53 = vadd.f32 %v330_v50, %v304_v45 }
  0x7d   : > { %v333_v55 = vsub.f32 0.0, %v331_v51  ;;  %v398_v51 = vld [vmem:[#allocation4] sm:$0x3] }
  0x7e   : > { %v334_v56 = vsub.f32 0.0, %v332_v53 }
  0x7f   : > { %v335_v57 = vmul.f32 1.442695, %v333_v55  ;;  %v341_v58 = vmax.f32 %v333_v55, -100.0  ;;  %v343_v59 = vsub.f32 %v333_v55, %v1063_v1 }
  0x80   : > { %v337_v61 = vmul.f32 1.442695, %v334_v56  ;;  %v342_v62 = vmax.f32 %v334_v56, -100.0  ;;  %v344_v63 = vsub.f32 %v334_v56, %v1065_v2 }
  0x81   : > { %701 = vpow2.f32 %v335_v57  ;;  %v345_v4 = vmax.f32 %v343_v59, -100.0  ;;  %v347_v5 = vmul.f32 %v341_v58, %v339_v52 }
  0x82   : > { %703 = vpow2.f32 %v337_v61  ;;  %v346_v6 = vmax.f32 %v344_v63, -100.0  ;;  %v348_v7 = vmul.f32 %v342_v62, %v340_v54  ;;  %v377_v54 = vld [vmem:[#allocation3] sm:$0x3] }
  0x83   : > { %v351_v9 = vmul.f32 %v349_v60, %v345_v4 }
  0x84   : > { %v352_v10 = vmul.f32 %v350_v0, %v346_v6 }
  0x85   : > { %v353_v11 = vadd.f32 %v351_v9, %v347_v5 }
  0x86   : > { %v354_v12 = vadd.f32 %v352_v10, %v348_v7 }
  0x87   : > { %v355_v13 = vsub.f32 0.0, %v353_v11 }
  0x88   : > { %v356_v14 = vsub.f32 0.0, %v354_v12 }
  0x89   : > { %v358_v15 = vrot.slane %v355_v13, 4 }
  0x8a   : > { %v364_v1 = vrot.slane %v356_v14, 4 }
  0x8b   : > { %v359_v16 = vadd.f32 %v358_v15, %v355_v13 }
  0x8c   : > { %v365_v17 = vadd.f32 %v364_v1, %v356_v14 }
  0x8d   : > { %v360_v18 = vrot.slane %v359_v16, 2 }
  0x8e   : > { %v702_v19 = vpop.eup %701  ;;  %v366_v2 = vrot.slane %v365_v17, 2 }
  0x8f   : > { %v704_v20 = vpop.eup %703  ;;  %v361_v21 = vadd.f32 %v360_v18, %v359_v16  ;;  %v378_v22 = vmul.f32 %v702_v19, %v1067_v3  ;;  %v399_v23 = vrot.slane %v702_v19, 4 }
  0x90   : > { %v367_v24 = vadd.f32 %v366_v2, %v365_v17  ;;  %v379_v25 = vmul.f32 %v704_v20, %v1073_v8  ;;  %v405_v26 = vrot.slane %v704_v20, 4 }
  0x91   : > { %v362_v27 = vrot.slane %v361_v21, 1  ;;  %v380_v28 = vrot.slane %v378_v22, 4  ;;  %v400_v29 = vadd.f32 %v702_v19, %v399_v23 }
  0x92   : > { %v368_v30 = vrot.slane %v367_v24, 1  ;;  %v386_v31 = vrot.slane %v379_v25, 4  ;;  %v406_v32 = vadd.f32 %v704_v20, %v405_v26 }
  0x93   : > { %v363_v33 = vadd.f32 %v362_v27, %v361_v21  ;;  %v381_v34 = vadd.f32 %v380_v28, %v378_v22  ;;  %v401_v35 = vrot.slane %v400_v29, 2 }
  0x94   : > { %v369_v37 = vadd.f32 %v368_v30, %v367_v24  ;;  %v387_v38 = vadd.f32 %v386_v31, %v379_v25  ;;  %v407_v39 = vrot.slane %v406_v32, 2 }
  0x95   : > { %v382_v40 = vrot.slane %v381_v34, 2  ;;  %v402_v3 = vadd.f32 %v401_v35, %v400_v29 }
  0x96   : > { %v373_v41 = vsel %vm372_vm0, %v369_v37, %v363_v33  ;;  %v388_v42 = vrot.slane %v387_v38, 2  ;;  %v408_v8 = vadd.f32 %v407_v39, %v406_v32 }
  0x97   : > { %v375_v43 = vadd.f32 %v373_v41, %v357_v36  ;;  %v383_v44 = vadd.f32 %v382_v40, %v381_v34  ;;  %v403_v45 = vrot.slane %v402_v3, 1 }
  0x98   : > { %v389_v46 = vadd.f32 %v388_v42, %v387_v38  ;;  %v409_v47 = vrot.slane %v408_v8, 1 }
  0x99   : > { %376 = vst [vmem:[#allocation2] sm:$0x3] %v375_v43  ;;  %v384_v48 = vrot.slane %v383_v44, 1  ;;  %v404_v49 = vadd.f32 %v403_v45, %v402_v3 }
  0x9a   : > { %v390_v50 = vrot.slane %v389_v46, 1  ;;  %v410_v52 = vadd.f32 %v409_v47, %v408_v8 }
  0x9b   : > { %v385_v53 = vadd.f32 %v384_v48, %v383_v44 }
  0x9c   : > { %v391_v55 = vadd.f32 %v390_v50, %v389_v46  ;;  %v413_v56 = vsel %vm372_vm0, %v410_v52, %v404_v49 }
  0x9d   : > { %v415_v57 = vadd.f32 %v413_v56, %v398_v51 }
  0x9e   : > { %v394_v58 = vsel %vm372_vm0, %v391_v55, %v385_v53 }
  0x9f   : > { %v396_v59 = vadd.f32 %v394_v58, %v377_v54  ;;  %416 = vst [vmem:[#allocation4] sm:$0x3] %v415_v57 }
  0xa0   : > { %v439_v60 = vld [vmem:[#allocation2] sm:$0x3] }
  0xa1   : > { %397 = vst [vmem:[#allocation3] sm:$0x3] %v396_v59  ;;  %440 = vst [vmem:[%s1079_s24] sm:$0x3] %v439_v60 }
  0xa6   : > { %v444_v61 = vld [vmem:[#allocation4] sm:$0x3] }
  0xa7   : > { %607 = vst [vmem:[%s1079_s24 + $0x4] sm:$0x3] %v444_v61 }
  0xa8   : > { %v441_v62 = vld [vmem:[#allocation3] sm:$0x3] }
  0xa9   : > { %606 = vst [vmem:[%s1079_s24 + $0x2] sm:$0x3] %v441_v62 }
  0xaa   : > { %802 = shalt.err (!%p799_p7)
}
  0xab   : > { %s803_s16 = scalar_lea.hbm %s1102_s1, 128  ;;  %s807_s26 = scalar_lea.hbm %s1155_s3, 256 }
  0xac   : > { %p804_p1 = scmp.ne.s32.totalorder %s1102_s1, %s803_s16  ;;  %p808_p3 = scmp.lt.s32.totalorder %s1102_s1, %s1155_s3 }
  0xad   : > { %p809_p8 = scmp.lt.s32.totalorder %s807_s26, %s803_s16 }
  0xae   : > { %p805_p10 = pnand %p804_p1, %p960_p9 }
  0xaf   : > { %p810_p0 = por %p809_p8, %p808_p3 }
  0xb0   : > { %p806_p13 = pneg %p805_p10 }
  0xb2   : > { %p811_p2 = pnand %p810_p0, %p806_p13 }
  0xb4   : > { %814 = shalt.err (!%p811_p2)
}
  0xb5   : > { %s883_s0 = smov 32   ;;  %s884_s30 = smov 2  }
  0xb6   : > { %621 = dma.vmem_to_hbm [thread:$0]  (%p960_p9), %s1097_s5, 128, %s1102_s1, %s451_s19, %s883_s0, %s883_s0, %s884_s30  }
  0xb7 PF: > { %s479_s4 = sand.u32 1, %s853_s12   ;;  %p634_p4 = pnand %p594_p12, %p967_p11 }
  0xb8   : > { %s480_s18 = scalar_lea.sflag [#allocation8], %s479_s4 }
  0xb9   : > { %p635_p5 = pneg %p634_p4 }
  0xbb   : > { %848 = dma.done.wait (%p635_p5), %s480_s18, 128  }
  0xbc   : > { %850 = vsyncadd (%p635_p5), %s480_s18, 4294967168  ;;  %s22_s17 = sadd.s32 1, %s873_s17   ;;  %s1176_s25 = sld [smem:[#allocation18_spill]] }
  0xbd   : > { %p19_p6 = scmp.ge.s32.totalorder %s22_s17, 4   ;;  %s1177_s15 = sld [smem:[#allocation16_spill]] }
  0xbe   : > { %s1178_s16 = sld [smem:[#allocation17_spill]]  ;;  %s1179_s12 = smov %s857_s13 }
  0xbf   : > { %s1180_s13 = smov %s861_s14  ;;  %21 = sbr.rel (!%p19_p6) target bundleno = 11 (0xb), region = 112 }
  0xc2   : > { %s1181_s14 = smov %s1176_s25 }
  0xc4   :  { %485 = vsyncpa [#allocation7], 1 }
  0xc5   :  { %487 = vsyncpa [#allocation7 + $0x1], 1 }
  0xc6   :  { %488 = vsyncpa [#allocation10], 1 }
  0xc7   :  { %490 = vsyncpa [#allocation10 + $0x1], 1 }
  0xc8   :  { %491 = vsyncpa [#allocation8], 1 }
  0xc9   :  { %493 = vsyncpa [#allocation8 + $0x1], 1 }

</bundles_post_ra>
